<compile_context>
chip_gen: v5e
topology: v5e:2x2
jax: 0.10.0
libtpu: 0.0.40
codegen_flags: <defaults>
</compile_context>

<pallas_src>
import functools

import jax
import jax.numpy as jnp
from jax.experimental import pallas as pl
from jax.experimental.pallas import tpu as pltpu

IN_CHANNELS = 3
OUT_CHANNELS = 16
KERNEL_SIZE = 3
POOL_K = 2
SCALING_FACTOR = 2.0


def _round_up(x, m):
    return (x + m - 1) // m * m


def _fused_kernel(p_ref, w_ref, b_ref, o_ref, *, scale, m_half, half):
    # One MXU matmul: lane-dense conv output, conv bias already folded in (ones col).
    y = jnp.dot(p_ref[...], w_ref[...], preferred_element_type=jnp.float32)  # (2*m_half, 2*half)
    y = jnp.tanh(y) * scale + b_ref[...]              # EUP tanh + VPU scale / bias add
    yh = jnp.maximum(y[:m_half, :], y[m_half:, :])    # oh pool: sublane-aligned halves
    o_ref[...] = jnp.maximum(yh[:, :half], yh[:, half:]).astype(o_ref.dtype)  # ow pool


def prepare_params(conv_weight, conv_bias, bias, H, W):
    """One-time layout prep.

    Builds:
      w_big (K_PAD, 2*HALF): block-banded conv weight.  Rows = (kh, w, c) plus one
        conv-bias row plus zero pad to a multiple of 8.  Columns = (ow_parity, o, pow)
        with pow padded to 8 so each parity half is exactly Cout*8 = 128 lanes.
      b_row (1, 2*HALF): the post-tanh bias in the same column layout.
    """
    f32 = jnp.float32
    Cout, Cin, KH, KW = conv_weight.shape
    OH, OW = H - KH + 1, W - KW + 1
    assert OH % POOL_K == 0 and OW % POOL_K == 0
    POW = OW // POOL_K
    POW_PAD = _round_up(POW, 8)
    HALF = Cout * POW_PAD
    assert HALF % 128 == 0
    K = KH * W * Cin
    K_PAD = _round_up(K + 1, 8)                       # +1 row for the folded conv bias

    wt = jnp.transpose(conv_weight.astype(f32), (2, 3, 1, 0))          # (KH, KW, Cin, Cout)
    ow_arr = 2 * jnp.arange(POW_PAD)[None, :] + jnp.arange(2)[:, None]  # (2, POW_PAD): ow = 2*pow + p
    kw_mat = jnp.arange(W)[:, None, None] - ow_arr[None, :, :]          # (W, 2, POW_PAD): kw = w - ow
    valid = ((kw_mat >= 0) & (kw_mat < KW) & (ow_arr[None, :, :] < OW)).astype(f32)
    kw_idx = jnp.clip(kw_mat, 0, KW - 1)
    blocks = wt[:, kw_idx, :, :] * valid[None, :, :, :, None, None]     # (KH, W, 2, POW_PAD, Cin, Cout)
    # -> rows (kh, w, c), cols (p, o, pow)
    w_core = jnp.transpose(blocks, (0, 1, 4, 2, 5, 3)).reshape(K, 2 * HALF)
    cb_row = jnp.tile(jnp.repeat(conv_bias.astype(f32).reshape(Cout), POW_PAD), 2)[None, :]
    pad_rows = jnp.zeros((K_PAD - K - 1, 2 * HALF), f32)
    w_big = jnp.concatenate([w_core, cb_row, pad_rows], axis=0)         # (K_PAD, 2*HALF)

    b_row = jnp.tile(jnp.repeat(bias.astype(f32).reshape(Cout), POW_PAD), 2)[None, :]
    return w_big, b_row


@functools.partial(jax.jit, static_argnames=("scaling_factor",))
def conv_tanh_scale_bias_pool(x_nchw, w_big, b_row, scaling_factor=SCALING_FACTOR):
    """x_nchw: (N, Cin, H, W); w_big/b_row from prepare_params.
    Returns (N, Cout, POH, POW) matching the PyTorch module."""
    f32 = jnp.float32
    N, Cin, H, W = x_nchw.shape
    Cout = OUT_CHANNELS
    KH = KW = KERNEL_SIZE
    OH, OW = H - KH + 1, W - KW + 1
    # TODO(synk): odd OH/OW (PyTorch MaxPool2d floors the last row/col) not handled;
    # the module's shapes give even OH/OW.
    assert OH % POOL_K == 0 and OW % POOL_K == 0
    POH, POW = OH // POOL_K, OW // POOL_K
    POH_PAD = _round_up(POH, 8)
    POW_PAD = _round_up(POW, 8)
    HALF = Cout * POW_PAD
    K = KH * W * Cin
    K_PAD = w_big.shape[0]
    M_HALF = N * POH_PAD
    M = 2 * M_HALF

    # ---- wrapper-side im2col (free layout plumbing, fuses with NCHW->NHWC transpose)
    xs = jnp.transpose(x_nchw.astype(f32), (0, 2, 3, 1)).reshape(N, H, W * Cin)
    parts = []
    for p in range(2):                                   # oh parity
        oh = jnp.clip(2 * jnp.arange(POH_PAD) + p, 0, OH - 1)   # padded poh rows clipped (finite junk)
        taps = [xs[:, oh + kh, :] for kh in range(KH)]           # each (N, POH_PAD, W*Cin)
        parts.append(jnp.concatenate(taps, axis=-1))             # (N, POH_PAD, K)
    patches = jnp.stack(parts, axis=0).reshape(M, K)             # rows = (p, n, poh)
    patches = jnp.concatenate(
        [patches,
         jnp.ones((M, 1), f32),                                  # folds conv bias into the matmul
         jnp.zeros((M, K_PAD - K - 1), f32)], axis=-1)           # (M, K_PAD)

    kernel = functools.partial(_fused_kernel, scale=float(scaling_factor),
                               m_half=M_HALF, half=HALF)

    out2d = pl.pallas_call(
        kernel,
        out_shape=jax.ShapeDtypeStruct((M_HALF, HALF), f32),
        grid_spec=pltpu.PrefetchScalarGridSpec(
            num_scalar_prefetch=0,
            grid=(1,),
            in_specs=[
                pl.BlockSpec((M, K_PAD), lambda i: (0, 0)),
                pl.BlockSpec((K_PAD, 2 * HALF), lambda i: (0, 0)),
                pl.BlockSpec((1, 2 * HALF), lambda i: (0, 0)),
            ],
            out_specs=pl.BlockSpec((M_HALF, HALF), lambda i: (0, 0)),
        ),
        compiler_params=pltpu.CompilerParams(dimension_semantics=("arbitrary",)),
    )(patches, w_big, b_row)

    # rows = (n, poh), lanes = (o, pow): drop padding, back to NCHW
    out = out2d.reshape(N, POH_PAD, Cout, POW_PAD)[:, :POH, :, :POW]
    return out.transpose(0, 2, 1, 3)


def _reference(x_nchw, conv_weight, conv_bias, bias, scaling_factor):
    y = jax.lax.conv_general_dilated(
        x_nchw.astype(jnp.float32), conv_weight.astype(jnp.float32),
        window_strides=(1, 1), padding="VALID",
        dimension_numbers=("NCHW", "OIHW", "NCHW"),
    )
    y = y + conv_bias.reshape(1, -1, 1, 1)
    y = jnp.tanh(y) * scaling_factor + bias.reshape(1, -1, 1, 1)
    y = jax.lax.reduce_window(
        y, -jnp.inf, jax.lax.max,
        window_dimensions=(1, 1, POOL_K, POOL_K),
        window_strides=(1, 1, POOL_K, POOL_K),
        padding="VALID",
    )
    return y


if __name__ == "__main__":
    key = jax.random.PRNGKey(0)
    k_x, k_w, k_cb, k_b = jax.random.split(key, 4)

    # small shapes consistent with the module: batch=2, Cin=3, 16x16 spatial
    x = jax.random.normal(k_x, (2, IN_CHANNELS, 16, 16), dtype=jnp.float32)

    # deterministic synthetic parameters (same shapes as nn.Conv2d + extra bias)
    fan_in = IN_CHANNELS * KERNEL_SIZE * KERNEL_SIZE
    w_scale = 1.0 / jnp.sqrt(jnp.float32(fan_in))
    conv_weight = (
        jax.random.uniform(k_w, (OUT_CHANNELS, IN_CHANNELS, KERNEL_SIZE, KERNEL_SIZE),
                           minval=-1.0, maxval=1.0) * w_scale
    ).astype(jnp.float32)
    conv_bias = (
        jax.random.uniform(k_cb, (OUT_CHANNELS,), minval=-1.0, maxval=1.0) * w_scale
    ).astype(jnp.float32)
    bias = (jax.random.normal(k_b, (OUT_CHANNELS, 1, 1)) * 0.02).astype(jnp.float32)

    # one-time constant layout prep (hoisted out of the per-call path)
    w_big, b_row = prepare_params(conv_weight, conv_bias, bias, 16, 16)
    w_big, b_row = jax.block_until_ready((w_big, b_row))

    out = conv_tanh_scale_bias_pool(x, w_big, b_row, scaling_factor=SCALING_FACTOR)
    out = jax.block_until_ready(out)

    ref = _reference(x, conv_weight, conv_bias, bias, SCALING_FACTOR)
    assert out.shape == ref.shape == (2, OUT_CHANNELS, 7, 7), out.shape
    assert jnp.allclose(out, ref, atol=1e-5, rtol=1e-5), float(jnp.max(jnp.abs(out - ref)))

    print("KERNEL_OK")
</pallas_src>

<mosaic_0001>
module attributes {stable_mosaic.version = 11 : i64} {
  func.func @_fused_kernel(%arg0: i32, %arg1: memref<32x152xf32, #tpu.memory_space<vmem>>, %arg2: memref<152x256xf32, #tpu.memory_space<vmem>>, %arg3: memref<1x256xf32, #tpu.memory_space<vmem>>, %arg4: memref<16x128xf32, #tpu.memory_space<vmem>>) attributes {dimension_semantics = [#tpu.dimension_semantics<arbitrary>], iteration_bounds = array<i64: 1>, scalar_prefetch = 0 : i64, scratch_operands = 0 : i64, tpu.core_type = #tpu.core_type<tc>, window_params = [{pipeline_mode = #tpu.pipeline_mode<synchronous>, transform_indices = @transform_0, window_bounds = array<i64: 32, 152>}, {pipeline_mode = #tpu.pipeline_mode<synchronous>, transform_indices = @transform_1, window_bounds = array<i64: 152, 256>}, {pipeline_mode = #tpu.pipeline_mode<synchronous>, transform_indices = @transform_2, window_bounds = array<i64: 1, 256>}, {pipeline_mode = #tpu.pipeline_mode<synchronous>, transform_indices = @transform_3, window_bounds = array<i64: 16, 128>}]} {
    %c0 = arith.constant 0 : index
    %c0_0 = arith.constant 0 : index
    %0 = vector.load %arg1[%c0, %c0_0] : memref<32x152xf32, #tpu.memory_space<vmem>>, vector<32x152xf32>
    %c0_1 = arith.constant 0 : index
    %c0_2 = arith.constant 0 : index
    %1 = vector.load %arg2[%c0_1, %c0_2] : memref<152x256xf32, #tpu.memory_space<vmem>>, vector<152x256xf32>
    %cst = arith.constant dense<0.000000e+00> : vector<32x256xf32>
    %2 = tpu.matmul %0, %1, %cst {dimension_numbers = #tpu.dot_dimension_numbers<[1], [0], [0], [1], [0, 0, 1, 1], [], []>} : vector<32x152xf32>, vector<152x256xf32>, vector<32x256xf32> -> vector<32x256xf32>
    %3 = math.tanh %2 : vector<32x256xf32>
    %cst_3 = arith.constant 2.000000e+00 : f32
    %4 = vector.broadcast %cst_3 : f32 to vector<32x256xf32>
    %5 = arith.mulf %3, %4 : vector<32x256xf32>
    %c0_4 = arith.constant 0 : index
    %c0_5 = arith.constant 0 : index
    %6 = vector.load %arg3[%c0_4, %c0_5] : memref<1x256xf32, #tpu.memory_space<vmem>>, vector<1x256xf32>
    %7 = vector.broadcast %6 : vector<1x256xf32> to vector<32x256xf32>
    %8 = arith.addf %5, %7 : vector<32x256xf32>
    %9 = vector.extract_strided_slice %8 {offsets = [0, 0], sizes = [16, 256], strides = [1, 1]} : vector<32x256xf32> to vector<16x256xf32>
    %10 = vector.extract_strided_slice %8 {offsets = [16, 0], sizes = [16, 256], strides = [1, 1]} : vector<32x256xf32> to vector<16x256xf32>
    %11 = arith.maximumf %9, %10 : vector<16x256xf32>
    %12 = vector.extract_strided_slice %11 {offsets = [0, 0], sizes = [16, 128], strides = [1, 1]} : vector<16x256xf32> to vector<16x128xf32>
    %13 = vector.extract_strided_slice %11 {offsets = [0, 128], sizes = [16, 128], strides = [1, 1]} : vector<16x256xf32> to vector<16x128xf32>
    %14 = arith.maximumf %12, %13 : vector<16x128xf32>
    %c0_6 = arith.constant 0 : index
    %c0_7 = arith.constant 0 : index
    %15 = vector.load %arg4[%c0_6, %c0_7] : memref<16x128xf32, #tpu.memory_space<vmem>>, vector<16x128xf32>
    tpu.vector_store %arg4[%c0_6, %c0_7], %14 {strides = array<i32>} : memref<16x128xf32, #tpu.memory_space<vmem>>, vector<16x128xf32>,
    return
  }
  func.func @transform_0(%arg0: i32) -> (i32, i32) {
    %c0_i32 = arith.constant 0 : i32
    %c0_i32_0 = arith.constant 0 : i32
    %c0_i32_1 = arith.constant 0 : i32
    return %c0_i32, %c0_i32_0 : i32, i32
  }
  func.func @transform_1(%arg0: i32) -> (i32, i32) {
    %c0_i32 = arith.constant 0 : i32
    %c0_i32_0 = arith.constant 0 : i32
    %c0_i32_1 = arith.constant 0 : i32
    return %c0_i32, %c0_i32_0 : i32, i32
  }
  func.func @transform_2(%arg0: i32) -> (i32, i32) {
    %c0_i32 = arith.constant 0 : i32
    %c0_i32_0 = arith.constant 0 : i32
    %c0_i32_1 = arith.constant 0 : i32
    return %c0_i32, %c0_i32_0 : i32, i32
  }
  func.func @transform_3(%arg0: i32) -> (i32, i32) {
    %c0_i32 = arith.constant 0 : i32
    %c0_i32_0 = arith.constant 0 : i32
    %c0_i32_1 = arith.constant 0 : i32
    return %c0_i32, %c0_i32_0 : i32, i32
  }
}

</mosaic_0001>

<bundles_post_ra>
// kernel: conv_tanh_scale_bias_pool.1
= control target key start
LH: loop header
LB: loop body
LE: loop exit
PB: predicated region body
PF: predicated region fallthrough
CT: control target
= control target key end

     0   :  { %vm60_vm0 = vcmask 195584   ;;  %s430_s1 = inlined_call_operand.vmem [shape: f32[152,256], index: 1, kind: input, shape index: {}]   ;;  %s431_s0 = inlined_call_operand.vmem [shape: f32[32,152], index: 0, kind: input, shape index: {}]   ;;  %s432_s2 = inlined_call_operand.vmem [shape: f32[1,256], index: 2, kind: input, shape index: {}]   ;;  %s433_s3 = inlined_call_operand.vmem [shape: f32[16,128], index: 3, kind: output, shape index: {}]  }
   0x1   :  { %v52_v0 = vld [vmem:[%s430_s1 + $0xf0] sm:$0xff]  ;;  %v53_v1 = vld [vmem:[%s430_s1 + $0xf8] sm:$0xff]  ;;  %v50_v2 = vld [vmem:[%s430_s1 + $0xe0] sm:$0xff] }
   0x2   :  { %73 = vmatpush.msra.mxu0 %v52_v0  ;;  %131 = vmatpush.msra.mxu2 %v53_v1  ;;  %v51_v3 = vld [vmem:[%s430_s1 + $0xe8] sm:$0xff]  ;;  %v48_v4 = vld [vmem:[%s430_s1 + $0xd0] sm:$0xff]  ;;  %v49_v5 = vld [vmem:[%s430_s1 + $0xd8] sm:$0xff] }
   0x3   :  { %v46_v6 = vld [vmem:[%s430_s1 + $0xc0] sm:$0xff]  ;;  %v47_v7 = vld [vmem:[%s430_s1 + $0xc8] sm:$0xff]  ;;  %v44_v8 = vld [vmem:[%s430_s1 + $0xb0] sm:$0xff] }
   0x4   :  { %74 = vmatpush.msra.mxu0 %v50_v2  ;;  %132 = vmatpush.msra.mxu2 %v51_v3  ;;  %v45_v9 = vld [vmem:[%s430_s1 + $0xb8] sm:$0xff]  ;;  %v42_v10 = vld [vmem:[%s430_s1 + $0xa0] sm:$0xff]  ;;  %v43_v11 = vld [vmem:[%s430_s1 + $0xa8] sm:$0xff] }
   0x5   :  { %v58_v12 = vld [vmem:[%s430_s1 + $0x120] sm:$0xff]  ;;  %v59_v13 = vld [vmem:[%s430_s1 + $0x128] sm:$0xff]  ;;  %v40_v14 = vld [vmem:[%s430_s1 + $0x90] sm:$0xff] }
   0x6   :  { %75 = vmatpush.msra.mxu0 %v48_v4  ;;  %133 = vmatpush.msra.mxu2 %v49_v5  ;;  %v41_v15 = vld [vmem:[%s430_s1 + $0x98] sm:$0xff]  ;;  %v56_v16 = vld [vmem:[%s430_s1 + $0x110] sm:$0xff]  ;;  %v54_v18 = vld [vmem:[%s430_s1 + $0x100] sm:$0xff] }
   0x7   :  { %115 = vmatpush.msra.mxu1 %v58_v12  ;;  %173 = vmatpush.msra.mxu3 %v59_v13  ;;  %v57_v17 = vld [vmem:[%s430_s1 + $0x118] sm:$0xff]  ;;  %v38_v19 = vld [vmem:[%s430_s1 + $0x80] sm:$0xff]  ;;  %v39_v20 = vld [vmem:[%s430_s1 + $0x88] sm:$0xff] }
   0x8   :  { %76 = vmatpush.msra.mxu0 %v46_v6  ;;  %134 = vmatpush.msra.mxu2 %v47_v7  ;;  %v55_v21 = vld [vmem:[%s430_s1 + $0x108] sm:$0xff]  ;;  %v36_v23 = vld [vmem:[%s430_s1 + $0x70] sm:$0xff]  ;;  %v37_v24 = vld [vmem:[%s430_s1 + $0x78] sm:$0xff] }
   0x9   :  { %116 = vmatpush.msra.mxu1 %v56_v16  ;;  %174 = vmatpush.msra.mxu3 %v57_v17  ;;  %v15_v22 = vld [vmem:[%s431_s0 + $0x8] sm:$0xff]  ;;  %v34_v25 = vld [vmem:[%s430_s1 + $0x60] sm:$0xff]  ;;  %v32_v27 = vld [vmem:[%s430_s1 + $0x50] sm:$0xff] }
   0xa   :  { %77 = vmatpush.msra.mxu0 %v44_v8  ;;  %135 = vmatpush.msra.mxu2 %v45_v9  ;;  %v35_v26 = vld [vmem:[%s430_s1 + $0x68] sm:$0xff]  ;;  %v33_v28 = vld [vmem:[%s430_s1 + $0x58] sm:$0xff]  ;;  %v30_v29 = vld [vmem:[%s430_s1 + $0x40] sm:$0xff] }
   0xb   :  { %117 = vmatpush.msra.mxu1 %v54_v18  ;;  %175 = vmatpush.msra.mxu3 %v55_v21  ;;  %v31_v30 = vld [vmem:[%s430_s1 + $0x48] sm:$0xff]  ;;  %v17_v31 = vld [vmem:[%s431_s0 + $0x18] sm:$0xff]  ;;  %v28_v32 = vld [vmem:[%s430_s1 + $0x30] sm:$0xff] }
   0xc   :  { %78 = vmatpush.msra.mxu0 %v42_v10  ;;  %136 = vmatpush.msra.mxu2 %v43_v11  ;;  %v29_v33 = vld [vmem:[%s430_s1 + $0x38] sm:$0xff]  ;;  %v26_v34 = vld [vmem:[%s430_s1 + $0x20] sm:$0xff]  ;;  %v27_v35 = vld [vmem:[%s430_s1 + $0x28] sm:$0xff] }
   0xd   :  { %231 = vmatmul.msk.f32.vlgmr.msra.gmra.mxu1 %vm60_vm0, %v15_v22  ;;  %235 = vmatmul.msk.f32.vlgmr.msra.gmra.mxu3 %vm60_vm0, %v15_v22  ;;  %v24_v36 = vld [vmem:[%s430_s1 + $0x10] sm:$0xff]  ;;  %v25_v37 = vld [vmem:[%s430_s1 + $0x18] sm:$0xff]  ;;  %v22_v38 = vld [vmem:[%s430_s1] sm:$0xff] }
   0xe   :  { %79 = vmatpush.msra.mxu0 %v40_v14  ;;  %137 = vmatpush.msra.mxu2 %v41_v15  ;;  %v23_v39 = vld [vmem:[%s430_s1 + $0x8] sm:$0xff]  ;;  %v14_v40 = vld [vmem:[%s431_s0] sm:$0xff]  ;;  %v16_v42 = vld [vmem:[%s431_s0 + $0x10] sm:$0xff] }
   0xf   :  { %v19_v41 = vld [vmem:[%s431_s0 + $0x28] sm:$0xff]  ;;  %v21_v43 = vld [vmem:[%s431_s0 + $0x38] sm:$0xff]  ;;  %v18_v44 = vld [vmem:[%s431_s0 + $0x20] sm:$0xff] }
  0x10   :  { %80 = vmatpush.msra.mxu0 %v38_v19  ;;  %138 = vmatpush.msra.mxu2 %v39_v20  ;;  %v20_v45 = vld [vmem:[%s431_s0 + $0x30] sm:$0xff]  ;;  %v205_v6 = vld [vmem:[%s432_s2] sm:$0x3] }
  0x11   :  { %v207_v10 = vperm.slane %v205_v6, 0  ;;  %v208_v12 = vperm.slane %v205_v6, 1 }
  0x12   :  { %81 = vmatpush.msra.mxu0 %v36_v23  ;;  %139 = vmatpush.msra.mxu2 %v37_v24 }
  0x14   :  { %82 = vmatpush.msra.mxu0 %v34_v25  ;;  %140 = vmatpush.msra.mxu2 %v35_v26 }
  0x15   :  { %232 = vmatmul.msk.f32.gmra.mxu1 %vm60_vm0, %v17_v31  ;;  %236 = vmatmul.msk.f32.gmra.mxu3 %vm60_vm0, %v17_v31 }
  0x16   :  { %83 = vmatpush.msra.mxu0 %v32_v27  ;;  %141 = vmatpush.msra.mxu2 %v33_v28 }
  0x18   :  { %84 = vmatpush.msra.mxu0 %v30_v29  ;;  %142 = vmatpush.msra.mxu2 %v31_v30 }
  0x1a   :  { %85 = vmatpush.msra.mxu0 %v28_v32  ;;  %143 = vmatpush.msra.mxu2 %v29_v33 }
  0x1c   :  { %86 = vmatpush.msra.mxu0 %v26_v34  ;;  %144 = vmatpush.msra.mxu2 %v27_v35 }
  0x1d   :  { %233 = vmatmul.msk.f32.gmra.mxu1 %vm60_vm0, %v19_v41  ;;  %237 = vmatmul.msk.f32.gmra.mxu3 %vm60_vm0, %v19_v41 }
  0x1e   :  { %87 = vmatpush.msra.mxu0 %v24_v36  ;;  %145 = vmatpush.msra.mxu2 %v25_v37 }
  0x20   :  { %88 = vmatpush.msra.mxu0 %v22_v38  ;;  %146 = vmatpush.msra.mxu2 %v23_v39 }
  0x21   :  { %89 = vmatmul.f32.vlgmr.msra.gmra.mxu0 %v14_v40  ;;  %147 = vmatmul.f32.vlgmr.msra.gmra.mxu2 %v14_v40 }
  0x25   :  { %234 = vmatmul.msk.f32.gmra.mxu1 %vm60_vm0, %v21_v43  ;;  %238 = vmatmul.msk.f32.gmra.mxu3 %vm60_vm0, %v21_v43 }
  0x29   :  { %92 = vmatmul.f32.gmra.mxu0 %v16_v42  ;;  %150 = vmatmul.f32.gmra.mxu2 %v16_v42 }
  0x31   :  { %95 = vmatmul.f32.gmra.mxu0 %v18_v44  ;;  %153 = vmatmul.f32.gmra.mxu2 %v18_v44 }
  0x39   :  { %98 = vmatmul.f32.gmra.mxu0 %v20_v45  ;;  %156 = vmatmul.f32.gmra.mxu2 %v20_v45 }
  0x8a   :  { %v119_v46 = vpop.f32.mrf.mxu1 }
  0x90   :  { %v177_v47 = vpop.f32.mrf.mxu3 }
  0x92   :  { %v122_v49 = vpop.f32.mrf.mxu1 }
  0x98   :  { %v180_v52 = vpop.f32.mrf.mxu3 }
  0x9a   :  { %v125_v53 = vpop.f32.mrf.mxu1 }
  0x9e   :  { %v90_v48 = vpop.f32.mrf.mxu0 }
  0x9f   :  { %v120_v55 = vadd.f32 %v119_v46, %v90_v48 }
  0xa0   :  { %v183_v59 = vpop.f32.mrf.mxu3 }
  0xa2   :  { %v128_v61 = vpop.f32.mrf.mxu1 }
  0xa4   :  { %v148_v50 = vpop.f32.mrf.mxu2 }
  0xa5   :  { %v178_v57 = vadd.f32 %v177_v47, %v148_v50 }
  0xa6   :  { %v93_v51 = vpop.f32.mrf.mxu0 }
  0xa7   :  { %v123_v63 = vadd.f32 %v122_v49, %v93_v51 }
  0xa8   :  { %v186_v8 = vpop.f32.mrf.mxu3 }
  0xac   :  { %v151_v54 = vpop.f32.mrf.mxu2 }
  0xad   :  { %v181_v2 = vadd.f32 %v180_v52, %v151_v54 }
  0xae   :  { %v96_v56 = vpop.f32.mrf.mxu0 }
  0xaf   :  { %v126_v58 = vadd.f32 %v125_v53, %v96_v56 }
  0xb1   :  { %239 = vtanh.f32 %v126_v58 }
  0xb2   :  { %241 = vtanh.f32 %v120_v55 }
  0xb3   :  { %243 = vtanh.f32 %v178_v57 }
  0xb4   :  { %v154_v60 = vpop.f32.mrf.mxu2 }
  0xb5   :  { %v184_v62 = vadd.f32 %v183_v59, %v154_v60 }
  0xb6   :  { %v99_v0 = vpop.f32.mrf.mxu0 }
  0xb7   :  { %v240_v1 = vpop.eup %239  ;;  %245 = vtanh.f32 %v184_v62  ;;  %v129_v3 = vadd.f32 %v128_v61, %v99_v0 }
  0xb8   :  { %v242_v4 = vpop.eup %241  ;;  %v201_v7 = vmul.f32 2.0, %v240_v1 }
  0xb9   :  { %v244_v5 = vpop.eup %243  ;;  %247 = vtanh.f32 %v129_v3  ;;  %v197_v9 = vmul.f32 2.0, %v242_v4 }
  0xba   :  { %249 = vtanh.f32 %v123_v63  ;;  %v198_v11 = vmul.f32 2.0, %v244_v5  ;;  %v215_v16 = vadd.f32 %v207_v10, %v201_v7 }
  0xbb   :  { %251 = vtanh.f32 %v181_v2  ;;  %v211_v20 = vadd.f32 %v207_v10, %v197_v9 }
  0xbc   :  { %v157_v13 = vpop.f32.mrf.mxu2  ;;  %v212_v21 = vadd.f32 %v208_v12, %v198_v11 }
  0xbd   :  { %v246_v14 = vpop.eup %245  ;;  %v187_v15 = vadd.f32 %v186_v8, %v157_v13  ;;  %v219_v24 = vmax.f32 %v211_v20, %v215_v16 }
  0xbe   :  { %v202_v17 = vmul.f32 2.0, %v246_v14 }
  0xbf   :  { %v248_v18 = vpop.eup %247  ;;  %253 = vtanh.f32 %v187_v15 }
  0xc0   :  { %v250_v19 = vpop.eup %249  ;;  %v216_v22 = vadd.f32 %v208_v12, %v202_v17  ;;  %v203_v26 = vmul.f32 2.0, %v248_v18 }
  0xc1   :  { %v252_v23 = vpop.eup %251  ;;  %v199_v27 = vmul.f32 2.0, %v250_v19 }
  0xc2   :  { %v220_v25 = vmax.f32 %v212_v21, %v216_v22  ;;  %v200_v28 = vmul.f32 2.0, %v252_v23  ;;  %v217_v31 = vadd.f32 %v207_v10, %v203_v26 }
  0xc3   :  { %v213_v33 = vadd.f32 %v207_v10, %v199_v27 }
  0xc4   :  { %v223_v29 = vmax.f32 %v219_v24, %v220_v25  ;;  %v214_v34 = vadd.f32 %v208_v12, %v200_v28 }
  0xc5   :  { %v254_v30 = vpop.eup %253  ;;  %v221_v36 = vmax.f32 %v213_v33, %v217_v31 }
  0xc6   :  { %225 = vst [vmem:[%s433_s3] sm:$0xff] %v223_v29  ;;  %v204_v32 = vmul.f32 2.0, %v254_v30 }
  0xc8   :  { %v218_v35 = vadd.f32 %v208_v12, %v204_v32 }
  0xca   :  { %v222_v37 = vmax.f32 %v214_v34, %v218_v35 }
  0xcc   :  { %v224_v38 = vmax.f32 %v221_v36, %v222_v37 }
  0xce   :  { %226 = vst [vmem:[%s433_s3 + $0x8] sm:$0xff] %v224_v38 }

</bundles_post_ra>
